<compile_context>
chip_gen: v6e
topology: v6e:2x2x1
jax: 0.10.0
libtpu: 0.0.40
codegen_flags: <defaults>
</compile_context>

<pallas_src>
import functools

import jax
import jax.numpy as jnp
from jax.experimental import pallas as pl
from jax.experimental.pallas import tpu as pltpu

VERY_BIG_NUMBER = 1e30
VERY_NEGATIVE_NUMBER = -VERY_BIG_NUMBER


def _round_up(x, m):
    return ((x + m - 1) // m) * m


def _pick_block_rows(m, n, itemsize, target_block_bytes=2 * 1024 * 1024):
    """Rows per grid step: ~2 MiB per (bm, N) input tile, multiple of 128,
    clamped to the (128-rounded) problem size so small problems use one block."""
    row_bytes = max(1, n * itemsize)
    bm = max(128, (target_block_bytes // row_bytes) // 128 * 128)
    return min(bm, _round_up(max(m, 1), 128))


def _tflinear_kernel(*refs, trilinear):
    if trilinear:
        a_ref, b_ref, m_ref, wa_ref, wb_ref, wab_ref, bias_ref, o_ref = refs
    else:
        a_ref, b_ref, m_ref, wa_ref, wb_ref, bias_ref, o_ref = refs
        wab_ref = None

    a = a_ref[...]                                  # [bm, N] native dtype
    b = b_ref[...]                                  # [bm, N]

    # Fused "concat + GEMV":
    #   [a | b | a*b] @ W.T == sum_lanes( a*Wa + b*Wb + (a*Wab)*b )
    # Weight slices are f32, so every product promotes to f32 even for bf16
    # activations (f32 accumulation like nn.Linear).
    s = a * wa_ref[...] + b * wb_ref[...]
    if trilinear:
        s = s + (a * wab_ref[...]) * b

    # Row sums produced into the lane-dense [sub, 128] output layout.
    # (Minor-axis reduce -> XLU; MXU stays idle.  If a v7x bundle dump ever
    #  shows the XLU slot binding, swap this line for an MXU dot against a
    #  ones column / block-diagonal reducer.)
    _, sub, lanes = o_ref.shape
    s3 = s.reshape(sub, lanes, s.shape[-1])         # layout-preserving split
    row_sums = jnp.sum(s3, axis=-1)                 # [sub, 128] f32

    logits = row_sums + bias_ref[0]                 # SMEM scalar bias
    # exp_mask fused in: logits + (1 - mask) * VERY_NEGATIVE_NUMBER
    o_ref[...] = logits[None] + (1.0 - m_ref[...]) * VERY_NEGATIVE_NUMBER


@functools.partial(jax.jit, static_argnames=("func", "block_rows"))
def tf_linear(a, b, mask, weight, bias, *, func="trilinear", block_rows=None):
    """Fused TFLinear forward.

    a, b   : [..., N] (same shape, f32 or bf16)
    mask   : a.shape[:-1]  (1.0 = keep, 0.0 = masked)
    weight : [1, k*N]  (PyTorch nn.Linear layout [out, in]; out == 1)
    bias   : [1]
    returns: a.shape[:-1] float32 logits after exp_mask
    """
    assert func in ("linear", "trilinear")
    trilinear = func == "trilinear"
    n_terms = 3 if trilinear else 2

    lead = a.shape[:-1]
    n = a.shape[-1]
    m = 1
    for d in lead:
        m *= d

    assert b.shape == a.shape
    assert mask.shape == lead
    assert weight.shape == (1, n_terms * n), weight.shape   # output_size == 1
    assert bias.shape == (1,)

    # TODO(synk): nn.Dropout(do_p) is identity in eval mode; training-mode
    # dropout (RNG + 1/(1-p) scaling) is not implemented here.

    a2 = a.reshape(m, n)                 # free reshapes of contiguous inputs
    b2 = b.reshape(m, n)
    itemsize = a2.dtype.itemsize

    bm = block_rows if block_rows is not None else _pick_block_rows(m, n, itemsize)
    assert bm % 128 == 0, "block_rows must be a multiple of 128"
    grid = pl.cdiv(m, bm)                # ragged M: last partial block is fine
    m_pad = grid * bm
    sub = bm // 128

    # Only the tiny O(M) mask is padded/relayouted; a and b are streamed as-is.
    mask_flat = mask.reshape(m).astype(jnp.float32)
    if m_pad != m:
        mask_flat = jnp.pad(mask_flat, (0, m_pad - m))
    mask3 = mask_flat.reshape(grid, sub, 128)        # lane-dense mask slab

    # nn.Linear weight row -> per-term [1, N] slices, in f32.
    w32 = weight.astype(jnp.float32)
    w_parts = [w32[:, i * n:(i + 1) * n] for i in range(n_terms)]
    bias32 = bias.astype(jnp.float32).reshape(1)

    row_spec = pl.BlockSpec((bm, n), lambda i: (i, 0))            # a, b stream
    md_spec = pl.BlockSpec((1, sub, 128), lambda i: (i, 0, 0))    # mask / out
    w_spec = pl.BlockSpec((1, n), lambda i: (0, 0))               # resident
    bias_spec = pl.BlockSpec(memory_space=pltpu.MemorySpace.SMEM)

    # Scoped-VMEM request sized from the real footprint (+50% headroom):
    # double-buffered a/b tiles + f32 intermediates + mask/out tiles + weights.
    blk_in = bm * n * itemsize
    need = (2 * 2 * blk_in                 # a, b double-buffered
            + 3 * bm * n * 4               # f32 intermediates (s, a*b, ...)
            + 2 * 2 * bm * 4               # mask + out tiles, double-buffered
            + n_terms * 8 * _round_up(n, 128) * 4   # padded weight rows
            + (64 << 10))                  # bias + misc slack
    vmem_limit = int(min(max(3 * need // 2, 8 << 20), 48 << 20))

    out3 = pl.pallas_call(
        functools.partial(_tflinear_kernel, trilinear=trilinear),
        out_shape=jax.ShapeDtypeStruct((grid, sub, 128), jnp.float32),
        grid_spec=pltpu.PrefetchScalarGridSpec(
            num_scalar_prefetch=0,
            grid=(grid,),
            in_specs=[row_spec, row_spec, md_spec]
                     + [w_spec] * n_terms + [bias_spec],
            out_specs=md_spec,
        ),
        compiler_params=pltpu.CompilerParams(
            dimension_semantics=("parallel",),   # row blocks are independent
            vmem_limit_bytes=vmem_limit,
        ),
    )(a2, b2, mask3, *w_parts, bias32)

    return out3.reshape(m_pad)[:m].reshape(lead)


def tf_linear_ref(a, b, mask, weight, bias, *, func="trilinear"):
    n = a.shape[-1]
    a2 = a.reshape(-1, n).astype(jnp.float32)
    b2 = b.reshape(-1, n).astype(jnp.float32)
    w = weight.astype(jnp.float32)
    if func == "trilinear":
        x = jnp.concatenate([a2, b2, a2 * b2], axis=1)
    else:
        x = jnp.concatenate([a2, b2], axis=1)
    logits = (x @ w.T + bias.astype(jnp.float32)).reshape(mask.shape)
    return logits + (1.0 - mask) * VERY_NEGATIVE_NUMBER


if __name__ == "__main__":
    key = jax.random.PRNGKey(0)
    batch, seq_a, seq_b, hidden = 2, 8, 16, 32          # M = 2*8*16 = 256 rows
    output_size = 1

    k_a, k_b, k_m, k_w, k_bias = jax.random.split(key, 5)
    a = jax.random.normal(k_a, (batch, seq_a, seq_b, hidden), dtype=jnp.float32)
    b = jax.random.normal(k_b, (batch, seq_a, seq_b, hidden), dtype=jnp.float32)
    mask = (jax.random.uniform(k_m, (batch, seq_a, seq_b)) > 0.25).astype(jnp.float32)

    # nn.Linear(3*hidden, 1) style init.
    in_features = 3 * hidden
    bound = 1.0 / (in_features ** 0.5)
    weight = jax.random.uniform(k_w, (output_size, in_features),
                                minval=-bound, maxval=bound, dtype=jnp.float32)
    bias = jax.random.uniform(k_bias, (output_size,),
                              minval=-bound, maxval=bound, dtype=jnp.float32)

    # trilinear variant (auto tile size)
    y = jax.block_until_ready(tf_linear(a, b, mask, weight, bias, func="trilinear"))
    y_ref = tf_linear_ref(a, b, mask, weight, bias, func="trilinear")
    assert y.shape == mask.shape
    assert jnp.allclose(y, y_ref, atol=1e-3, rtol=1e-4), "trilinear mismatch vs reference"

    # linear variant (weight is [1, 2*hidden])
    w_lin = weight[:, : 2 * hidden]
    y2 = jax.block_until_ready(tf_linear(a, b, mask, w_lin, bias, func="linear"))
    y2_ref = tf_linear_ref(a, b, mask, w_lin, bias, func="linear")
    assert jnp.allclose(y2, y2_ref, atol=1e-3, rtol=1e-4), "linear mismatch vs reference"

    # ragged M (3*7*11 = 231 rows) with a forced multi-step grid: exercises the
    # no-pad partial-last-block path (OOB rows sliced off) and grid > 1.
    ar = jax.random.normal(k_a, (3, 7, 11, hidden), dtype=jnp.float32)
    br = jax.random.normal(k_b, (3, 7, 11, hidden), dtype=jnp.float32)
    mr = (jax.random.uniform(k_m, (3, 7, 11)) > 0.5).astype(jnp.float32)
    yr = jax.block_until_ready(
        tf_linear(ar, br, mr, weight, bias, func="trilinear", block_rows=128))
    yr_ref = tf_linear_ref(ar, br, mr, weight, bias, func="trilinear")
    assert jnp.allclose(yr, yr_ref, atol=1e-3, rtol=1e-4), "ragged-M mismatch vs reference"

    # bf16 activations streamed natively (f32 weights / f32 accumulation).
    abf = a.astype(jnp.bfloat16)
    bbf = b.astype(jnp.bfloat16)
    yb = jax.block_until_ready(tf_linear(abf, bbf, mask, weight, bias, func="trilinear"))
    yb_ref = tf_linear_ref(abf, bbf, mask, weight, bias, func="trilinear")
    assert jnp.allclose(yb, yb_ref, atol=5e-2, rtol=1e-2), "bf16 mismatch vs reference"

    print("KERNEL_OK")
</pallas_src>

<mosaic_0001>
module attributes {stable_mosaic.version = 11 : i64} {
  func.func @_tflinear_kernel(%arg0: i32, %arg1: memref<256x32xf32, #tpu.memory_space<vmem>>, %arg2: memref<256x32xf32, #tpu.memory_space<vmem>>, %arg3: memref<1x2x128xf32, #tpu.memory_space<vmem>>, %arg4: memref<1x32xf32, #tpu.memory_space<vmem>>, %arg5: memref<1x32xf32, #tpu.memory_space<vmem>>, %arg6: memref<1x32xf32, #tpu.memory_space<vmem>>, %arg7: memref<1xf32, #tpu.memory_space<smem>>, %arg8: memref<1x2x128xf32, #tpu.memory_space<vmem>>) attributes {dimension_semantics = [#tpu.dimension_semantics<parallel>], iteration_bounds = array<i64: 1>, scalar_prefetch = 0 : i64, scratch_operands = 0 : i64, tpu.core_type = #tpu.core_type<tc>, window_params = [{transform_indices = @transform_0, window_bounds = array<i64: 256, 32>}, {transform_indices = @transform_1, window_bounds = array<i64: 256, 32>}, {transform_indices = @transform_2, window_bounds = array<i64: 1, 2, 128>}, {pipeline_mode = #tpu.pipeline_mode<synchronous>, transform_indices = @transform_3, window_bounds = array<i64: 1, 32>}, {pipeline_mode = #tpu.pipeline_mode<synchronous>, transform_indices = @transform_4, window_bounds = array<i64: 1, 32>}, {pipeline_mode = #tpu.pipeline_mode<synchronous>, transform_indices = @transform_5, window_bounds = array<i64: 1, 32>}, {transform_indices = @transform_6, window_bounds = array<i64: 1>}, {transform_indices = @transform_7, window_bounds = array<i64: 1, 2, 128>}]} {
    %c0 = arith.constant 0 : index
    %c0_0 = arith.constant 0 : index
    %0 = vector.load %arg1[%c0, %c0_0] : memref<256x32xf32, #tpu.memory_space<vmem>>, vector<256x32xf32>
    %c0_1 = arith.constant 0 : index
    %c0_2 = arith.constant 0 : index
    %1 = vector.load %arg2[%c0_1, %c0_2] : memref<256x32xf32, #tpu.memory_space<vmem>>, vector<256x32xf32>
    %c0_3 = arith.constant 0 : index
    %c0_4 = arith.constant 0 : index
    %2 = vector.load %arg4[%c0_3, %c0_4] : memref<1x32xf32, #tpu.memory_space<vmem>>, vector<1x32xf32>
    %3 = vector.broadcast %2 : vector<1x32xf32> to vector<256x32xf32>
    %4 = arith.mulf %0, %3 : vector<256x32xf32>
    %c0_5 = arith.constant 0 : index
    %c0_6 = arith.constant 0 : index
    %5 = vector.load %arg5[%c0_5, %c0_6] : memref<1x32xf32, #tpu.memory_space<vmem>>, vector<1x32xf32>
    %6 = vector.broadcast %5 : vector<1x32xf32> to vector<256x32xf32>
    %7 = arith.mulf %1, %6 : vector<256x32xf32>
    %8 = arith.addf %4, %7 : vector<256x32xf32>
    %c0_7 = arith.constant 0 : index
    %c0_8 = arith.constant 0 : index
    %9 = vector.load %arg6[%c0_7, %c0_8] : memref<1x32xf32, #tpu.memory_space<vmem>>, vector<1x32xf32>
    %10 = vector.broadcast %9 : vector<1x32xf32> to vector<256x32xf32>
    %11 = arith.mulf %0, %10 : vector<256x32xf32>
    %12 = arith.mulf %11, %1 : vector<256x32xf32>
    %13 = arith.addf %8, %12 : vector<256x32xf32>
    %14 = vector.shape_cast %13 : vector<256x32xf32> to vector<2x128x32xf32>
    %cst = arith.constant dense<0.000000e+00> : vector<2x128xf32>
    %15 = vector.multi_reduction <add>, %14, %cst [2] : vector<2x128x32xf32> to vector<2x128xf32>
    %c0_9 = arith.constant 0 : index
    %16 = memref.load %arg7[%c0_9] : memref<1xf32, #tpu.memory_space<smem>>
    %17 = vector.broadcast %16 : f32 to vector<2x128xf32>
    %18 = arith.addf %15, %17 : vector<2x128xf32>
    %19 = vector.shape_cast %18 : vector<2x128xf32> to vector<1x2x128xf32>
    %c0_10 = arith.constant 0 : index
    %c0_11 = arith.constant 0 : index
    %c0_12 = arith.constant 0 : index
    %20 = vector.load %arg3[%c0_10, %c0_11, %c0_12] : memref<1x2x128xf32, #tpu.memory_space<vmem>>, vector<1x2x128xf32>
    %cst_13 = arith.constant 1.000000e+00 : f32
    %21 = vector.broadcast %cst_13 : f32 to vector<1x2x128xf32>
    %22 = arith.subf %21, %20 : vector<1x2x128xf32>
    %cst_14 = arith.constant -1.000000e+30 : f32
    %23 = vector.broadcast %cst_14 : f32 to vector<1x2x128xf32>
    %24 = arith.mulf %22, %23 : vector<1x2x128xf32>
    %25 = arith.addf %19, %24 : vector<1x2x128xf32>
    %c0_15 = arith.constant 0 : index
    %c0_16 = arith.constant 0 : index
    %c0_17 = arith.constant 0 : index
    %26 = vector.load %arg8[%c0_15, %c0_16, %c0_17] : memref<1x2x128xf32, #tpu.memory_space<vmem>>, vector<1x2x128xf32>
    tpu.vector_store %arg8[%c0_15, %c0_16, %c0_17], %25 {strides = array<i32>} : memref<1x2x128xf32, #tpu.memory_space<vmem>>, vector<1x2x128xf32>,
    return
  }
  func.func @transform_0(%arg0: i32) -> (i32, i32) {
    %c0_i32 = arith.constant 0 : i32
    %c0_i32_0 = arith.constant 0 : i32
    return %arg0, %c0_i32 : i32, i32
  }
  func.func @transform_1(%arg0: i32) -> (i32, i32) {
    %c0_i32 = arith.constant 0 : i32
    %c0_i32_0 = arith.constant 0 : i32
    return %arg0, %c0_i32 : i32, i32
  }
  func.func @transform_2(%arg0: i32) -> (i32, i32, i32) {
    %c0_i32 = arith.constant 0 : i32
    %c0_i32_0 = arith.constant 0 : i32
    %c0_i32_1 = arith.constant 0 : i32
    return %arg0, %c0_i32, %c0_i32_0 : i32, i32, i32
  }
  func.func @transform_3(%arg0: i32) -> (i32, i32) {
    %c0_i32 = arith.constant 0 : i32
    %c0_i32_0 = arith.constant 0 : i32
    %c0_i32_1 = arith.constant 0 : i32
    return %c0_i32, %c0_i32_0 : i32, i32
  }
  func.func @transform_4(%arg0: i32) -> (i32, i32) {
    %c0_i32 = arith.constant 0 : i32
    %c0_i32_0 = arith.constant 0 : i32
    %c0_i32_1 = arith.constant 0 : i32
    return %c0_i32, %c0_i32_0 : i32, i32
  }
  func.func @transform_5(%arg0: i32) -> (i32, i32) {
    %c0_i32 = arith.constant 0 : i32
    %c0_i32_0 = arith.constant 0 : i32
    %c0_i32_1 = arith.constant 0 : i32
    return %c0_i32, %c0_i32_0 : i32, i32
  }
  func.func @transform_6(%arg0: i32) -> i32 {
    %c0_i32 = arith.constant 0 : i32
    %c0_i32_0 = arith.constant 0 : i32
    return %c0_i32 : i32
  }
  func.func @transform_7(%arg0: i32) -> (i32, i32, i32) {
    %c0_i32 = arith.constant 0 : i32
    %c0_i32_0 = arith.constant 0 : i32
    %c0_i32_1 = arith.constant 0 : i32
    return %arg0, %c0_i32, %c0_i32_0 : i32, i32, i32
  }
}

</mosaic_0001>

<bundles_post_ra>
// kernel: tf_linear.1
= control target key start
LH: loop header
LB: loop body
LE: loop exit
PB: predicated region body
PF: predicated region fallthrough
CT: control target
= control target key end

     0   :  { %13 = vsyncpa [#allocation4], 0  ;;  %s1452_s0 = inlined_call_operand.hbm [shape: f32[256,32], index: 0, kind: input, shape index: {}]   ;;  %s1453_s1 = inlined_call_operand.hbm [shape: f32[256,32], index: 1, kind: input, shape index: {}]   ;;  %s1454_s2 = inlined_call_operand.vmem [shape: f32[1,2,128], index: 2, kind: input, shape index: {}]   ;;  %s1455_s3 = inlined_call_operand.vmem [shape: f32[1,32], index: 3, kind: input, shape index: {}]   ;;  %s1456_s4 = inlined_call_operand.vmem [shape: f32[1,32], index: 4, kind: input, shape index: {}]   ;;  %s1457_s5 = inlined_call_operand.vmem [shape: f32[1,32], index: 5, kind: input, shape index: {}]   ;;  %s1458_s6 = inlined_call_operand.<no memory space> [shape: f32[1], index: 6, kind: input, shape index: {}]   ;;  %s1459_s7 = inlined_call_operand.vmem [shape: f32[1,2,128], index: 7, kind: output, shape index: {}]  }
   0x1   :  { %14 = vsyncpa [#allocation6], 0  ;;  %s1047_s24 = smov [#allocation3]  }
   0x2   :  { %s20_s25 = sshll.u32 %s1047_s24, 4  ;;  %s21_s25 = int_to_ptr.vmem [resolvable:$true] %s20_s25 }
   0x3   :  { %s1011_s26 = scalar_lea.vmem %s21_s25, 4096  ;;  %p1016_p1 = scmp.lt.s32.totalorder %s21_s25, %s21_s25 }
   0x4   :  { %p1012_p0 = scmp.ne.s32.totalorder %s21_s25, %s1011_s26  ;;  %p1017_p2 = scmp.lt.s32.totalorder %s1011_s26, %s1011_s26 }
   0x6   :  { %p1018_p3 = por %p1017_p2, %p1016_p1 }
   0x8   :  { %p1019_p4 = pnand %p1018_p3, %p1012_p0 }
   0xa   :  { %1022 = shalt.err (!%p1019_p4)
}
   0xb   :  { %s1048_s27 = smov 128   ;;  %s1049_s28 = smov 8  }
   0xc   :  { %26 = dma.hbm_to_vmem [thread:$0]  %s1452_s0, 4096, %s21_s25, [#allocation4], %s1048_s27, %s1048_s27, %s1049_s28  }
   0xd   :  { %s1050_s8 = smov [#allocation5]  }
   0xe   :  { %s32_s9 = sshll.u32 %s1050_s8, 4  ;;  %s33_s9 = int_to_ptr.vmem [resolvable:$true] %s32_s9 }
   0xf   :  { %s1031_s10 = scalar_lea.vmem %s33_s9, 4096  ;;  %p1036_p6 = scmp.lt.s32.totalorder %s33_s9, %s33_s9 }
  0x10   :  { %p1032_p5 = scmp.ne.s32.totalorder %s33_s9, %s1031_s10  ;;  %p1037_p7 = scmp.lt.s32.totalorder %s1031_s10, %s1031_s10 }
  0x12   :  { %p1038_p8 = por %p1037_p7, %p1036_p6 }
  0x14   :  { %p1039_p9 = pnand %p1038_p8, %p1032_p5 }
  0x16   :  { %1042 = shalt.err (!%p1039_p9)
}
  0x17   :  { %38 = dma.hbm_to_vmem [thread:$0]  %s1453_s1, 4096, %s33_s9, [#allocation6], %s1048_s27, %s1048_s27, %s1049_s28  }
  0x18   :  { %1043 = dma.done.wait [#allocation4], 4096  }
  0x19   :  { %1044 = vsyncadd [#allocation4], 4294963200 }
  0x1a   :  { %1045 = dma.done.wait [#allocation6], 4096  }
  0x1b   :  { %1046 = vsyncadd [#allocation6], 4294963200  ;;  %v57_v0 = vld [vmem:[#allocation3 + $0x10] sm:$0xff]  ;;  %v1101_v2 = vld [vmem:[%s1455_s3] ss:$0 sm:$0xff]  ;;  %vm332_vm0 = vcmask 261120  }
  0x1c   :  { %v89_v1 = vld [vmem:[#allocation5 + $0x10] sm:$0xff]  ;;  %v128_v3 = vmul.f32 %v1101_v2, %v57_v0  ;;  %v1107_v4 = vld [vmem:[%s1456_s4] ss:$0 sm:$0xff]  ;;  %v58_v12 = vld [vmem:[#allocation3 + $0x18] sm:$0xff]  ;;  %vm804_vm1 = vcmask 130112   ;;  %vm811_vm2 = vcmask 195712  }
  0x1d   :  { %v1112_v5 = vld [vmem:[%s1457_s5] ss:$0 sm:$0xff]  ;;  %v167_v7 = vmul.f32 %v1107_v4, %v89_v1  ;;  %v90_v13 = vld [vmem:[#allocation5 + $0x18] sm:$0xff]  ;;  %v129_v15 = vmul.f32 %v1101_v2, %v58_v12  ;;  %v56_v18 = vld [vmem:[#allocation3 + $0x8] sm:$0xff]  ;;  %vm818_vm3 = vcmask 261312   ;;  %vm825_vm4 = vcmask 326912  }
  0x1e   :  { %v55_v6 = vld [vmem:[#allocation3] sm:$0xff]  ;;  %v238_v8 = vmul.f32 %v1112_v5, %v57_v0  ;;  %v168_v16 = vmul.f32 %v1107_v4, %v90_v13  ;;  %v239_v17 = vmul.f32 %v1112_v5, %v58_v12  ;;  %v88_v19 = vld [vmem:[#allocation5 + $0x8] sm:$0xff]  ;;  %v127_v24 = vmul.f32 %v1101_v2, %v56_v18  ;;  %v62_v40 = vld [vmem:[#allocation3 + $0x38] sm:$0xff] }
  0x1f   :  { %v87_v9 = vld [vmem:[#allocation5] sm:$0xff]  ;;  %v126_v10 = vmul.f32 %v1101_v2, %v55_v6  ;;  %v236_v11 = vmul.f32 %v1112_v5, %v55_v6  ;;  %v60_v20 = vld [vmem:[#allocation3 + $0x28] sm:$0xff]  ;;  %v199_v21 = vadd.f32 %v167_v7, %v128_v3  ;;  %v166_v29 = vmul.f32 %v1107_v4, %v88_v19  ;;  %v94_v41 = vld [vmem:[#allocation5 + $0x38] sm:$0xff] }
  0x20   :  { %v165_v14 = vmul.f32 %v1107_v4, %v87_v9  ;;  %v270_v22 = vmul.f32 %v238_v8, %v89_v1  ;;  %v92_v25 = vld [vmem:[#allocation5 + $0x28] sm:$0xff]  ;;  %v200_v27 = vadd.f32 %v168_v16, %v129_v15  ;;  %v271_v28 = vmul.f32 %v239_v17, %v90_v13  ;;  %v59_v30 = vld [vmem:[#allocation3 + $0x20] sm:$0xff]  ;;  %v61_v46 = vld [vmem:[#allocation3 + $0x30] sm:$0xff] }
  0x21   :  { %v268_v23 = vmul.f32 %v236_v11, %v87_v9  ;;  %v237_v32 = vmul.f32 %v1112_v5, %v56_v18  ;;  %v131_v33 = vmul.f32 %v1101_v2, %v60_v20  ;;  %v170_v34 = vmul.f32 %v1107_v4, %v92_v25  ;;  %v91_v35 = vld [vmem:[#allocation5 + $0x20] sm:$0xff]  ;;  %v93_v51 = vld [vmem:[#allocation5 + $0x30] sm:$0xff]  ;;  %v64_v56 = vld [vmem:[#allocation3 + $0x48] sm:$0xff] }
  0x22   :  { %v197_v26 = vadd.f32 %v165_v14, %v126_v10  ;;  %v302_v31 = vadd.f32 %v270_v22, %v199_v21  ;;  %v303_v37 = vadd.f32 %v271_v28, %v200_v27  ;;  %v198_v38 = vadd.f32 %v166_v29, %v127_v24  ;;  %v96_v61 = vld [vmem:[#allocation5 + $0x48] sm:$0xff]  ;;  %v63_v3 = vld [vmem:[#allocation3 + $0x40] sm:$0xff]  ;;  %v66_v15 = vld [vmem:[#allocation3 + $0x58] sm:$0xff] }
  0x23   :  { %v241_v39 = vmul.f32 %v1112_v5, %v60_v20  ;;  %v269_v43 = vmul.f32 %v237_v32, %v88_v19  ;;  %v202_v44 = vadd.f32 %v170_v34, %v131_v33  ;;  %v130_v45 = vmul.f32 %v1101_v2, %v59_v30  ;;  %v95_v6 = vld [vmem:[#allocation5 + $0x40] sm:$0xff]  ;;  %v98_v20 = vld [vmem:[#allocation5 + $0x58] sm:$0xff] }
  0x24   :  { %v300_v36 = vadd.f32 %v268_v23, %v197_v26  ;;  %v339_v42 = vsel %vm332_vm0, %v302_v31, 0.0  ;;  %v342_v48 = vsel %vm332_vm0, %v303_v37, 0.0  ;;  %v169_v50 = vmul.f32 %v1107_v4, %v91_v35  ;;  %v97_v26 = vld [vmem:[#allocation5 + $0x50] sm:$0xff] }
  0x25   :  { %340 = vadd.xlane.f32.xlu1 %v339_v42  ;;  %v273_v49 = vmul.f32 %v241_v39, %v92_v25  ;;  %v301_v52 = vadd.f32 %v269_v43, %v198_v38  ;;  %v240_v53 = vmul.f32 %v1112_v5, %v59_v30  ;;  %v133_v54 = vmul.f32 %v1101_v2, %v62_v40  ;;  %v65_v25 = vld [vmem:[#allocation3 + $0x50] sm:$0xff] }
  0x26   :  { %v333_v47 = vsel %vm332_vm0, %v300_v36, 0.0  ;;  %v172_v55 = vmul.f32 %v1107_v4, %v94_v41  ;;  %v201_v58 = vadd.f32 %v169_v50, %v130_v45  ;;  %v243_v59 = vmul.f32 %v1112_v5, %v62_v40  ;;  %v100_v36 = vld [vmem:[#allocation5 + $0x68] sm:$0xff] }
  0x27   :  { %334 = vadd.xlane.f32.xlu0 %v333_v47  ;;  %v305_v57 = vadd.f32 %v273_v49, %v202_v44  ;;  %v132_v60 = vmul.f32 %v1101_v2, %v61_v46  ;;  %v336_v62 = vsel %vm332_vm0, %v301_v52, 0.0  ;;  %v272_v63 = vmul.f32 %v240_v53, %v91_v35  ;;  %v68_v35 = vld [vmem:[#allocation3 + $0x68] sm:$0xff]  ;;  %v102_v52 = vld [vmem:[#allocation5 + $0x78] sm:$0xff] }
  0x28   :  { %v204_v0 = vadd.f32 %v172_v55, %v133_v54  ;;  %v171_v1 = vmul.f32 %v1107_v4, %v93_v51  ;;  %v275_v8 = vmul.f32 %v243_v59, %v94_v41  ;;  %v242_v9 = vmul.f32 %v1112_v5, %v61_v46  ;;  %v67_v41 = vld [vmem:[#allocation3 + $0x60] sm:$0xff] }
  0x29   :  { %343 = vadd.xlane.f32.xlu1 %v342_v48  ;;  %v348_v7 = vsel %vm332_vm0, %v305_v57, 0.0  ;;  %v135_v10 = vmul.f32 %v1101_v2, %v64_v56  ;;  %v304_v11 = vadd.f32 %v272_v63, %v201_v58  ;;  %v174_v13 = vmul.f32 %v1107_v4, %v96_v61  ;;  %v99_v46 = vld [vmem:[#allocation5 + $0x60] sm:$0xff] }
  0x2a   :  { %v203_v12 = vadd.f32 %v171_v1, %v132_v60  ;;  %v245_v14 = vmul.f32 %v1112_v5, %v64_v56  ;;  %v307_v16 = vadd.f32 %v275_v8, %v204_v0  ;;  %v274_v17 = vmul.f32 %v242_v9, %v93_v51  ;;  %v70_v51 = vld [vmem:[#allocation3 + $0x78] sm:$0xff] }
  0x2b   :  { %337 = vadd.xlane.f32.xlu0 %v336_v62  ;;  %v134_v18 = vmul.f32 %v1101_v2, %v63_v3  ;;  %v173_v19 = vmul.f32 %v1107_v4, %v95_v6  ;;  %v345_v21 = vsel %vm332_vm0, %v304_v11, 0.0  ;;  %v206_v22 = vadd.f32 %v174_v13, %v135_v10  ;;  %v101_v62 = vld [vmem:[#allocation5 + $0x70] sm:$0xff]  ;;  %v104_v11 = vld [vmem:[#allocation5 + $0x88] sm:$0xff] }
  0x2c   :  { %v277_v23 = vmul.f32 %v245_v14, %v96_v61  ;;  %v244_v24 = vmul.f32 %v1112_v5, %v63_v3  ;;  %v354_v27 = vsel %vm332_vm0, %v307_v16, 0.0  ;;  %v306_v28 = vadd.f32 %v274_v17, %v203_v12  ;;  %v69_v61 = vld [vmem:[#allocation3 + $0x70] sm:$0xff]  ;;  %v71_v16 = vld [vmem:[#allocation3 + $0x80] sm:$0xff] }
  0x2d   :  { %349 = vadd.xlane.f32.xlu1 %v348_v7  ;;  %v205_v29 = vadd.f32 %v173_v19, %v134_v18  ;;  %v137_v30 = vmul.f32 %v1101_v2, %v66_v15  ;;  %v176_v33 = vmul.f32 %v1107_v4, %v98_v20  ;;  %v247_v34 = vmul.f32 %v1112_v5, %v66_v15 }
  0x2e   :  { %v309_v31 = vadd.f32 %v277_v23, %v206_v22  ;;  %v276_v32 = vmul.f32 %v244_v24, %v95_v6  ;;  %v351_v37 = vsel %vm332_vm0, %v306_v28, 0.0  ;;  %v136_v38 = vmul.f32 %v1101_v2, %v65_v25  ;;  %v72_v6 = vld [vmem:[#allocation3 + $0x88] sm:$0xff] }
  0x2f   :  { %346 = vadd.xlane.f32.xlu0 %v345_v21  ;;  %v175_v39 = vmul.f32 %v1107_v4, %v97_v26  ;;  %v246_v40 = vmul.f32 %v1112_v5, %v65_v25  ;;  %v208_v44 = vadd.f32 %v176_v33, %v137_v30  ;;  %v279_v45 = vmul.f32 %v247_v34, %v98_v20  ;;  %v103_v21 = vld [vmem:[#allocation5 + $0x80] sm:$0xff]  ;;  %v74_v25 = vld [vmem:[#allocation3 + $0x98] sm:$0xff] }
  0x30   :  { %v360_v42 = vsel %vm332_vm0, %v309_v31, 0.0  ;;  %v308_v43 = vadd.f32 %v276_v32, %v205_v29  ;;  %v139_v49 = vmul.f32 %v1101_v2, %v68_v35  ;;  %v178_v50 = vmul.f32 %v1107_v4, %v100_v36 }
  0x31   :  { %355 = vadd.xlane.f32.xlu1 %v354_v27  ;;  %v207_v47 = vadd.f32 %v175_v39, %v136_v38  ;;  %v278_v48 = vmul.f32 %v246_v40, %v97_v26  ;;  %v311_v54 = vadd.f32 %v279_v45, %v208_v44  ;;  %v249_v55 = vmul.f32 %v1112_v5, %v68_v35  ;;  %v106_v26 = vld [vmem:[#allocation5 + $0x98] sm:$0xff]  ;;  %v73_v35 = vld [vmem:[#allocation3 + $0x90] sm:$0xff]  ;;  %v76_v45 = vld [vmem:[#allocation3 + $0xa8] sm:$0xff] }
  0x32   :  { %v357_v53 = vsel %vm332_vm0, %v308_v43, 0.0  ;;  %v138_v56 = vmul.f32 %v1101_v2, %v67_v41  ;;  %v210_v58 = vadd.f32 %v178_v50, %v139_v49  ;;  %v177_v59 = vmul.f32 %v1107_v4, %v99_v46 }
  0x33   :  { %352 = vadd.xlane.f32.xlu0 %v351_v37  ;;  %v310_v57 = vadd.f32 %v278_v48, %v207_v47  ;;  %v248_v60 = vmul.f32 %v1112_v5, %v67_v41  ;;  %v366_v63 = vsel %vm332_vm0, %v311_v54, 0.0  ;;  %v281_v0 = vmul.f32 %v249_v55, %v100_v36  ;;  %v105_v36 = vld [vmem:[#allocation5 + $0x90] sm:$0xff] }
  0x34   :  { %v141_v1 = vmul.f32 %v1101_v2, %v70_v51  ;;  %v180_v3 = vmul.f32 %v1107_v4, %v102_v52  ;;  %v209_v8 = vadd.f32 %v177_v59, %v138_v56  ;;  %v251_v10 = vmul.f32 %v1112_v5, %v70_v51  ;;  %v75_v51 = vld [vmem:[#allocation3 + $0xa0] sm:$0xff] }
  0x35   :  { %361 = vadd.xlane.f32.xlu1 %v360_v42  ;;  %v363_v7 = vsel %vm332_vm0, %v310_v57, 0.0  ;;  %v280_v9 = vmul.f32 %v248_v60, %v99_v46  ;;  %v313_v12 = vadd.f32 %v281_v0, %v210_v58  ;;  %v140_v14 = vmul.f32 %v1101_v2, %v69_v61  ;;  %v108_v46 = vld [vmem:[#allocation5 + $0xa8] sm:$0xff]  ;;  %v107_v56 = vld [vmem:[#allocation5 + $0xa0] sm:$0xff] }
  0x36   :  { %v212_v13 = vadd.f32 %v180_v3, %v141_v1  ;;  %v179_v15 = vmul.f32 %v1107_v4, %v101_v62  ;;  %v283_v18 = vmul.f32 %v251_v10, %v102_v52  ;;  %v250_v19 = vmul.f32 %v1112_v5, %v69_v61  ;;  %v78_v61 = vld [vmem:[#allocation3 + $0xb8] sm:$0xff]  ;;  %v109_v10 = vld [vmem:[#allocation5 + $0xb0] sm:$0xff] }
  0x37   :  { %358 = vadd.xlane.f32.xlu0 %v357_v53  ;;  %v312_v17 = vadd.f32 %v280_v9, %v209_v8  ;;  %v143_v20 = vmul.f32 %v1101_v2, %v72_v6  ;;  %v182_v23 = vmul.f32 %v1107_v4, %v104_v11  ;;  %v253_v24 = vmul.f32 %v1112_v5, %v72_v6  ;;  %v77_v9 = vld [vmem:[#allocation3 + $0xb0] sm:$0xff] }
  0x38   :  { %v211_v22 = vadd.f32 %v179_v15, %v140_v14  ;;  %v372_v27 = vsel %vm332_vm0, %v313_v12, 0.0  ;;  %v315_v28 = vadd.f32 %v283_v18, %v212_v13  ;;  %v282_v29 = vmul.f32 %v250_v19, %v101_v62  ;;  %v110_v62 = vld [vmem:[#allocation5 + $0xb8] sm:$0xff]  ;;  %v80_v19 = vld [vmem:[#allocation3 + $0xc8] sm:$0xff] }
  0x39   :  { %367 = vadd.xlane.f32.xlu1 %v366_v63  ;;  %v142_v30 = vmul.f32 %v1101_v2, %v71_v16  ;;  %v214_v31 = vadd.f32 %v182_v23, %v143_v20  ;;  %v285_v32 = vmul.f32 %v253_v24, %v104_v11  ;;  %v181_v33 = vmul.f32 %v1107_v4, %v103_v21  ;;  %v112_v20 = vld [vmem:[#allocation5 + $0xc8] sm:$0xff]  ;;  %v79_v24 = vld [vmem:[#allocation3 + $0xc0] sm:$0xff] }
  0x3a   :  { %v252_v34 = vmul.f32 %v1112_v5, %v71_v16  ;;  %v369_v37 = vsel %vm332_vm0, %v312_v17, 0.0  ;;  %v314_v38 = vadd.f32 %v282_v29, %v211_v22  ;;  %v145_v39 = vmul.f32 %v1101_v2, %v74_v25  ;;  %v111_v29 = vld [vmem:[#allocation5 + $0xc0] sm:$0xff] }
  0x3b   :  { %364 = vadd.xlane.f32.xlu0 %v363_v7  ;;  %v184_v40 = vmul.f32 %v1107_v4, %v106_v26  ;;  %v378_v41 = vsel %vm332_vm0, %v315_v28, 0.0  ;;  %v213_v42 = vadd.f32 %v181_v33, %v142_v30  ;;  %v255_v44 = vmul.f32 %v1112_v5, %v74_v25 }
  0x3c   :  { %v284_v43 = vmul.f32 %v252_v34, %v103_v21  ;;  %v317_v47 = vadd.f32 %v285_v32, %v214_v31  ;;  %v144_v49 = vmul.f32 %v1101_v2, %v73_v35  ;;  %v183_v50 = vmul.f32 %v1107_v4, %v105_v36  ;;  %v82_v34 = vld [vmem:[#allocation3 + $0xd8] sm:$0xff] }
  0x3d   :  { %373 = vadd.xlane.f32.xlu1 %v372_v27  ;;  %v216_v48 = vadd.f32 %v184_v40, %v145_v39  ;;  %v375_v52 = vsel %vm332_vm0, %v314_v38, 0.0  ;;  %v287_v54 = vmul.f32 %v255_v44, %v106_v26  ;;  %v254_v55 = vmul.f32 %v1112_v5, %v73_v35  ;;  %v114_v35 = vld [vmem:[#allocation5 + $0xd8] sm:$0xff]  ;;  %v81_v44 = vld [vmem:[#allocation3 + $0xd0] sm:$0xff] }
  0x3e   :  { %v316_v53 = vadd.f32 %v284_v43, %v213_v42  ;;  %v215_v57 = vadd.f32 %v183_v50, %v144_v49  ;;  %v147_v58 = vmul.f32 %v1101_v2, %v76_v45  ;;  %v186_v59 = vmul.f32 %v1107_v4, %v108_v46 }
  0x3f   :  { %370 = vadd.xlane.f32.xlu0 %v369_v37  ;;  %v257_v60 = vmul.f32 %v1112_v5, %v76_v45  ;;  %v319_v63 = vadd.f32 %v287_v54, %v216_v48  ;;  %v286_v0 = vmul.f32 %v254_v55, %v105_v36  ;;  %v146_v1 = vmul.f32 %v1101_v2, %v75_v51  ;;  %v113_v45 = vld [vmem:[#allocation5 + $0xd0] sm:$0xff]  ;;  %v84_v54 = vld [vmem:[#allocation3 + $0xe8] sm:$0xff] }
  0x40   :  { %v218_v3 = vadd.f32 %v186_v59, %v147_v58  ;;  %v185_v7 = vmul.f32 %v1107_v4, %v107_v56  ;;  %v256_v8 = vmul.f32 %v1112_v5, %v75_v51  ;;  %v384_v11 = vsel %vm332_vm0, %v317_v47, 0.0  ;;  %v116_v55 = vld [vmem:[#allocation5 + $0xe8] sm:$0xff] }
  0x41   :  { %379 = vadd.xlane.f32.xlu1 %v378_v41  ;;  %v289_v6 = vmul.f32 %v257_v60, %v108_v46  ;;  %v381_v12 = vsel %vm332_vm0, %v316_v53, 0.0  ;;  %v149_v13 = vmul.f32 %v1101_v2, %v78_v61  ;;  %v188_v14 = vmul.f32 %v1107_v4, %v110_v62  ;;  %v83_v60 = vld [vmem:[#allocation3 + $0xe0] sm:$0xff] }
  0x42   :  { %v318_v15 = vadd.f32 %v286_v0, %v215_v57  ;;  %v217_v16 = vadd.f32 %v185_v7, %v146_v1  ;;  %v288_v17 = vmul.f32 %v256_v8, %v107_v56  ;;  %v259_v18 = vmul.f32 %v1112_v5, %v78_v61  ;;  %v115_v1 = vld [vmem:[#allocation5 + $0xe0] sm:$0xff] }
  0x43   :  { %376 = vadd.xlane.f32.xlu0 %v375_v52  ;;  %v390_v21 = vsel %vm332_vm0, %v319_v63, 0.0  ;;  %v148_v22 = vmul.f32 %v1101_v2, %v77_v9  ;;  %v187_v23 = vmul.f32 %v1107_v4, %v109_v10  ;;  %v321_v25 = vadd.f32 %v289_v6, %v218_v3 }
  0x44   :  { %v320_v26 = vadd.f32 %v288_v17, %v217_v16  ;;  %v220_v27 = vadd.f32 %v188_v14, %v149_v13  ;;  %v258_v28 = vmul.f32 %v1112_v5, %v77_v9  ;;  %v291_v30 = vmul.f32 %v259_v18, %v110_v62  ;;  %v118_v16 = vld [vmem:[#allocation5 + $0xf8] sm:$0xff] }
  0x45   :  { %385 = vadd.xlane.f32.xlu1 %v384_v11  ;;  %v151_v31 = vmul.f32 %v1101_v2, %v80_v19  ;;  %v190_v32 = vmul.f32 %v1107_v4, %v112_v20  ;;  %v261_v33 = vmul.f32 %v1112_v5, %v80_v19  ;;  %v387_v36 = vsel %vm332_vm0, %v318_v15, 0.0  ;;  %v86_v15 = vld [vmem:[#allocation3 + $0xf8] sm:$0xff]  ;;  %v85_v19 = vld [vmem:[#allocation3 + $0xf0] sm:$0xff] }
  0x46   :  { %v219_v37 = vadd.f32 %v187_v23, %v148_v22  ;;  %v290_v38 = vmul.f32 %v258_v28, %v109_v10  ;;  %v150_v39 = vmul.f32 %v1101_v2, %v79_v24  ;;  %v189_v42 = vmul.f32 %v1107_v4, %v111_v29 }
  0x47   :  { %382 = vadd.xlane.f32.xlu0 %v381_v12  ;;  %v222_v40 = vadd.f32 %v190_v32, %v151_v31  ;;  %v293_v41 = vmul.f32 %v261_v33, %v112_v20  ;;  %v260_v43 = vmul.f32 %v1112_v5, %v79_v24  ;;  %v396_v46 = vsel %vm332_vm0, %v321_v25, 0.0  ;;  %v117_v20 = vld [vmem:[#allocation5 + $0xf0] sm:$0xff] }
  0x48   :  { %v393_v47 = vsel %vm332_vm0, %v320_v26, 0.0  ;;  %v153_v48 = vmul.f32 %v1101_v2, %v82_v34  ;;  %v192_v49 = vmul.f32 %v1107_v4, %v114_v35  ;;  %v323_v50 = vadd.f32 %v291_v30, %v220_v27 }
  0x49   :  { %391 = vadd.xlane.f32.xlu1 %v390_v21  ;;  %v221_v51 = vadd.f32 %v189_v42, %v150_v39  ;;  %v292_v52 = vmul.f32 %v260_v43, %v111_v29  ;;  %v263_v53 = vmul.f32 %v1112_v5, %v82_v34  ;;  %v322_v56 = vadd.f32 %v290_v38, %v219_v37 }
  0x4a   :  { %v325_v57 = vadd.f32 %v293_v41, %v222_v40  ;;  %v152_v58 = vmul.f32 %v1101_v2, %v81_v44  ;;  %v191_v59 = vmul.f32 %v1107_v4, %v113_v45  ;;  %v224_v62 = vadd.f32 %v192_v49, %v153_v48 }
  0x4b   :  { %388 = vadd.xlane.f32.xlu0 %v387_v36  ;;  %v324_v61 = vadd.f32 %v292_v52, %v221_v51  ;;  %v295_v63 = vmul.f32 %v263_v53, %v114_v35  ;;  %v262_v0 = vmul.f32 %v1112_v5, %v81_v44  ;;  %v155_v6 = vmul.f32 %v1101_v2, %v84_v54 }
  0x4c   :  { %v223_v3 = vadd.f32 %v191_v59, %v152_v58  ;;  %v194_v7 = vmul.f32 %v1107_v4, %v116_v55  ;;  %v265_v8 = vmul.f32 %v1112_v5, %v84_v54  ;;  %v402_v9 = vsel %vm332_vm0, %v323_v50, 0.0 }
  0x4d   :  { %397 = vadd.xlane.f32.xlu1 %v396_v46  ;;  %v294_v10 = vmul.f32 %v262_v0, %v113_v45  ;;  %v154_v11 = vmul.f32 %v1101_v2, %v83_v60  ;;  %v399_v12 = vsel %vm332_vm0, %v322_v56, 0.0  ;;  %v193_v13 = vmul.f32 %v1107_v4, %v115_v1  ;;  %v463_v45 = vld [vmem:[%s1454_s2] sm:$0x3] }
  0x4e   :  { %v264_v14 = vmul.f32 %v1112_v5, %v83_v60  ;;  %v408_v17 = vsel %vm332_vm0, %v325_v57, 0.0  ;;  %v405_v18 = vsel %vm332_vm0, %v324_v61, 0.0  ;;  %v327_v21 = vadd.f32 %v295_v63, %v224_v62 }
  0x4f   :  { %394 = vadd.xlane.f32.xlu0 %v393_v47  ;;  %v326_v22 = vadd.f32 %v294_v10, %v223_v3  ;;  %v226_v23 = vadd.f32 %v194_v7, %v155_v6  ;;  %v297_v24 = vmul.f32 %v265_v8, %v116_v55  ;;  %v225_v25 = vadd.f32 %v193_v13, %v154_v11 }
  0x50   :  { %v157_v26 = vmul.f32 %v1101_v2, %v86_v15  ;;  %v196_v27 = vmul.f32 %v1107_v4, %v118_v16  ;;  %v267_v28 = vmul.f32 %v1112_v5, %v86_v15  ;;  %v296_v29 = vmul.f32 %v264_v14, %v115_v1 }
  0x51   :  { %403 = vadd.xlane.f32.xlu1 %v402_v9  ;;  %v156_v30 = vmul.f32 %v1101_v2, %v85_v19  ;;  %v195_v31 = vmul.f32 %v1107_v4, %v117_v20  ;;  %v266_v32 = vmul.f32 %v1112_v5, %v85_v19  ;;  %v414_v33 = vsel %vm332_vm0, %v327_v21, 0.0 }
  0x52   :  { %v329_v34 = vadd.f32 %v297_v24, %v226_v23  ;;  %v228_v35 = vadd.f32 %v196_v27, %v157_v26  ;;  %v299_v36 = vmul.f32 %v267_v28, %v118_v16  ;;  %v411_v37 = vsel %vm332_vm0, %v326_v22, 0.0 }
  0x53   :  { %400 = vadd.xlane.f32.xlu0 %v399_v12  ;;  %v328_v38 = vadd.f32 %v296_v29, %v225_v25  ;;  %v227_v39 = vadd.f32 %v195_v31, %v156_v30  ;;  %v298_v40 = vmul.f32 %v266_v32, %v117_v20  ;;  %v467_v44 = vlaneseq }
  0x54   :  { %v420_v2 = vsel %vm332_vm0, %v329_v34, 0.0  ;;  %v331_v41 = vadd.f32 %v299_v36, %v228_v35  ;;  %v464_v46 = vsub.f32 1.0, %v463_v45  ;;  %v1051_v51 = vmov 0  }
  0x55   :  { %409 = vadd.xlane.f32.xlu1 %v408_v17  ;;  %v417_v4 = vsel %vm332_vm0, %v328_v38, 0.0  ;;  %v330_v5 = vadd.f32 %v298_v40, %v227_v39  ;;  %v1245_v47 = vshrl.u32 %v467_v44, 7  ;;  %1001 = vset.pattern.permute.xlu0 %v1051_v51  ;;  %v1260_v7 = vstv %s1458_s6 }
  0x56   :  { %v426_v42 = vsel %vm332_vm0, %v331_v41, 0.0  ;;  %v465_v48 = vmul.f32 -1e+30, %v464_v46  ;;  %1002 = vset.pattern.permute.xlu1 %v1051_v51  ;;  %vm832_vm5 = vcmask 392512   ;;  %vm839_vm6 = vcmask 458112  }
  0x57   :  { %406 = vadd.xlane.f32.xlu0 %v405_v18  ;;  %v423_v43 = vsel %vm332_vm0, %v330_v5, 0.0  ;;  %v469_v49 = vsub.s32 0, %v1245_v47  ;;  %v536_v52 = vsub.s32 1, %v1245_v47  ;;  %vm846_vm7 = vcmask 523712  }
  0x58   :  { %vm853_vm8 = vcmask 589312   ;;  %vm860_vm9 = vcmask 654912   ;;  %vm867_vm10 = vcmask 720512   ;;  %vm874_vm11 = vcmask 786112  }
  0x59   :  { %415 = vadd.xlane.f32.xlu1 %v414_v33  ;;  %v470_v50 = vrot.slane %v465_v48, %v469_v49  ;;  %v537_v53 = vrot.slane %v465_v48, %v536_v52  ;;  %vm881_vm12 = vcmask 851712   ;;  %vm888_vm13 = vcmask 917312  }
  0x5a   :  { %vm895_vm14 = vcmask 982912   ;;  %vm902_vm15 = vcmask 1048512   ;;  %vm983_vm0 = vcmask 1041409  }
  0x5b   :  { %412 = vadd.xlane.f32.xlu0 %v411_v37 }
  0x5d   :  { %421 = vadd.xlane.f32.xlu1 %v420_v2 }
  0x5f   :  { %418 = vadd.xlane.f32.xlu0 %v417_v4 }
  0x61   :  { %427 = vadd.xlane.f32.xlu1 %v426_v42 }
  0x63   :  { %424 = vadd.xlane.f32.xlu0 %v423_v43 }
  0x72   :  { %476 = vbcast.lane.b32.xlu1 %v470_v50, 264 }
  0x76   :  { %480 = vbcast.lane.b32.xlu1 %v470_v50, 272 }
  0x79   :  { %472 = vbcast.lane.b32.xlu0 %v470_v50, 256 }
  0x7a   :  { %484 = vbcast.lane.b32.xlu1 %v470_v50, 280 }
  0x7d   :  { %488 = vbcast.lane.b32.xlu0 %v470_v50, 288 }
  0x7e   :  { %492 = vbcast.lane.b32.xlu1 %v470_v50, 296 }
  0x81   :  { %496 = vbcast.lane.b32.xlu0 %v470_v50, 304 }
  0x82   :  { %500 = vbcast.lane.b32.xlu1 %v470_v50, 312 }
  0x85   :  { %504 = vbcast.lane.b32.xlu0 %v470_v50, 320 }
  0x86   :  { %508 = vbcast.lane.b32.xlu1 %v470_v50, 328 }
  0x89   :  { %512 = vbcast.lane.b32.xlu0 %v470_v50, 336 }
  0x8a   :  { %516 = vbcast.lane.b32.xlu1 %v470_v50, 344 }
  0x8d   :  { %520 = vbcast.lane.b32.xlu0 %v470_v50, 352 }
  0x8e   :  { %524 = vbcast.lane.b32.xlu1 %v470_v50, 360 }
  0x91   :  { %528 = vbcast.lane.b32.xlu0 %v470_v50, 368 }
  0x92   :  { %532 = vbcast.lane.b32.xlu1 %v470_v50, 376 }
  0x95   :  { %539 = vbcast.lane.b32.xlu0 %v537_v53, 256 }
  0x96   :  { %543 = vbcast.lane.b32.xlu1 %v537_v53, 264 }
  0x99   :  { %547 = vbcast.lane.b32.xlu0 %v537_v53, 272 }
  0x9a   :  { %551 = vbcast.lane.b32.xlu1 %v537_v53, 280 }
  0x9d   :  { %555 = vbcast.lane.b32.xlu0 %v537_v53, 288 }
  0x9e   :  { %559 = vbcast.lane.b32.xlu1 %v537_v53, 296 }
  0xa1   :  { %563 = vbcast.lane.b32.xlu0 %v537_v53, 304 }
  0xa2   :  { %567 = vbcast.lane.b32.xlu1 %v537_v53, 312 }
  0xa5   :  { %571 = vbcast.lane.b32.xlu0 %v537_v53, 320 }
  0xa6   :  { %575 = vbcast.lane.b32.xlu1 %v537_v53, 328 }
  0xa9   :  { %579 = vbcast.lane.b32.xlu0 %v537_v53, 336 }
  0xaa   :  { %583 = vbcast.lane.b32.xlu1 %v537_v53, 344 }
  0xad   :  { %587 = vbcast.lane.b32.xlu0 %v537_v53, 352 }
  0xae   :  { %v341_v54 = vpop.xlane.xlu1 %340  ;;  %591 = vbcast.lane.b32.xlu1 %v537_v53, 360 }
  0xaf   :  { %v433_v36 = vadd.f32 %v1260_v7, %v341_v54 }
  0xb0   :  { %v335_v55 = vpop.xlane.xlu0 %334 }
  0xb1   :  { %595 = vbcast.lane.b32.xlu0 %v537_v53, 368  ;;  %v431_v31 = vadd.f32 %v1260_v7, %v335_v55 }
  0xb2   :  { %v344_v56 = vpop.xlane.xlu1 %343  ;;  %599 = vbcast.lane.b32.xlu1 %v537_v53, 376 }
  0xb3   :  { %v434_v40 = vadd.f32 %v1260_v7, %v344_v56 }
  0xb4   :  { %v338_v57 = vpop.xlane.xlu0 %337 }
  0xb5   :  { %v432_v30 = vadd.f32 %v1260_v7, %v338_v57 }
  0xb6   :  { %v350_v58 = vpop.xlane.xlu1 %349 }
  0xb7   :  { %v436_v43 = vadd.f32 %v1260_v7, %v350_v58 }
  0xb8   :  { %v347_v59 = vpop.xlane.xlu0 %346 }
  0xb9   :  { %v435_v2 = vadd.f32 %v1260_v7, %v347_v59 }
  0xba   :  { %v356_v60 = vpop.xlane.xlu1 %355 }
  0xbb   :  { %v438_v51 = vadd.f32 %v1260_v7, %v356_v60 }
  0xbc   :  { %v353_v61 = vpop.xlane.xlu0 %352 }
  0xbd   :  { %v437_v45 = vadd.f32 %v1260_v7, %v353_v61 }
  0xbe   :  { %v1249_v62 = vpop.xlane.xlu1 %361 }
  0xbf   :  { %v440_v57 = vadd.f32 %v1260_v7, %v1249_v62 }
  0xc0   :  { %v359_v63 = vpop.xlane.xlu0 %358 }
  0xc1   :  { %v439_v52 = vadd.f32 %v1260_v7, %v359_v63 }
  0xc2   :  { %v1251_v0 = vpop.xlane.xlu1 %367 }
  0xc3   :  { %v442_v60 = vadd.f32 %v1260_v7, %v1251_v0 }
  0xc4   :  { %v365_v1 = vpop.xlane.xlu0 %364 }
  0xc5   :  { %v441_v58 = vadd.f32 %v1260_v7, %v365_v1 }
  0xc6   :  { %v1253_v3 = vpop.xlane.xlu1 %373 }
  0xc8   :  { %v1255_v6 = vpop.xlane.xlu0 %370 }
  0xca   :  { %v380_v8 = vpop.xlane.xlu1 %379 }
  0xcb   :  { %v1263_v9 = vadd.f32 %v1260_v7, %v380_v8 }
  0xcc   :  { %v1265_v10 = vpop.xlane.xlu0 %376 }
  0xce   :  { %v1267_v11 = vpop.xlane.xlu1 %385 }
  0xcf   :  { %v448_v0 = vadd.f32 %v1260_v7, %v1267_v11 }
  0xd0   :  { %v1269_v12 = vpop.xlane.xlu0 %382 }
  0xd1   :  { %v447_v62 = vadd.f32 %v1260_v7, %v1269_v12 }
  0xd2   :  { %v1271_v13 = vpop.xlane.xlu1 %391 }
  0xd4   :  { %v1273_v14 = vpop.xlane.xlu0 %388 }
  0xd6   :  { %v1275_v15 = vpop.xlane.xlu1 %397 }
  0xd8   :  { %v1277_v16 = vpop.xlane.xlu0 %394 }
  0xda   :  { %v1279_v17 = vpop.xlane.xlu1 %403 }
  0xdc   :  { %v1281_v18 = vpop.xlane.xlu0 %400 }
  0xde   :  { %v1283_v19 = vpop.xlane.xlu1 %409 }
  0xe0   :  { %v1285_v20 = vpop.xlane.xlu0 %406 }
  0xe2   :  { %v1287_v21 = vpop.xlane.xlu1 %415 }
  0xe4   :  { %v1289_v22 = vpop.xlane.xlu0 %412 }
  0xe6   :  { %v422_v23 = vpop.xlane.xlu1 %421 }
  0xe7   :  { %v1292_v24 = vadd.f32 %v1260_v7, %v422_v23 }
  0xe8   :  { %v1294_v25 = vpop.xlane.xlu0 %418 }
  0xea   :  { %v428_v26 = vpop.xlane.xlu1 %427 }
  0xeb   :  { %v1297_v27 = vadd.f32 %v1260_v7, %v428_v26 }
  0xec   :  { %v425_v28 = vpop.xlane.xlu0 %424 }
  0xed   :  { %v1300_v29 = vadd.f32 %v1260_v7, %v425_v28 }
  0xee   :  { %v477_v32 = vpop.permute.xlu1 %476 }
  0xef   :  { %v634_v33 = vadd.f32 %v477_v32, %v432_v30  ;;  %v449_v32 = vadd.f32 %v1260_v7, %v1273_v14  ;;  %v453_v14 = vadd.f32 %v1260_v7, %v1281_v18  ;;  %v454_v18 = vadd.f32 %v1260_v7, %v1279_v17 }
  0xf0   :  { %v473_v34 = vpop.permute.xlu0 %472 }
  0xf1   :  { %v633_v35 = vadd.f32 %v473_v34, %v431_v31  ;;  %701 = vperm.xlu1 %1002, %v634_v33  }
  0xf2   :  { %v481_v37 = vpop.permute.xlu1 %480 }
  0xf3   :  { %698 = vperm.xlu0 %1001, %v633_v35   ;;  %v635_v38 = vadd.f32 %v481_v37, %v433_v36  ;;  %v451_v36 = vadd.f32 %v1260_v7, %v1277_v16  ;;  %v452_v16 = vadd.f32 %v1260_v7, %v1275_v15 }
  0xf4   :  { %v489_v39 = vpop.permute.xlu0 %488 }
  0xf5   :  { %704 = vperm.xlu1 %1002, %v635_v38   ;;  %v637_v4 = vadd.f32 %v489_v39, %v435_v2 }
  0xf6   :  { %v485_v41 = vpop.permute.xlu1 %484 }
  0xf7   :  { %v636_v5 = vadd.f32 %v485_v41, %v434_v40  ;;  %v450_v40 = vadd.f32 %v1260_v7, %v1271_v13 }
  0xf8   :  { %v497_v42 = vpop.permute.xlu0 %496 }
  0xf9   :  { %707 = vperm.xlu0 %1001, %v636_v5   ;;  %710 = vperm.xlu1 %1002, %v637_v4   ;;  %v639_v48 = vadd.f32 %v497_v42, %v437_v45  ;;  %v455_v5 = vadd.f32 %v1260_v7, %v1285_v20  ;;  %v456_v20 = vadd.f32 %v1260_v7, %v1283_v19 }
  0xfa   :  { %v493_v46 = vpop.permute.xlu1 %492 }
  0xfb   :  { %v638_v49 = vadd.f32 %v493_v46, %v436_v43  ;;  %v457_v46 = vadd.f32 %v1260_v7, %v1289_v22  ;;  %v444_v22 = vadd.f32 %v1260_v7, %v1253_v3 }
  0xfc   :  { %v505_v50 = vpop.permute.xlu0 %504 }
  0xfd   :  { %713 = vperm.xlu0 %1001, %v638_v49   ;;  %716 = vperm.xlu1 %1002, %v639_v48   ;;  %v641_v54 = vadd.f32 %v505_v50, %v439_v52 }
  0xfe   :  { %v501_v53 = vpop.permute.xlu1 %500 }
  0xff   :  { %v640_v55 = vadd.f32 %v501_v53, %v438_v51  ;;  %v443_v51 = vadd.f32 %v1260_v7, %v1255_v6  ;;  %v445_v6 = vadd.f32 %v1260_v7, %v1265_v10 }
 0x100   :  { %v513_v56 = vpop.permute.xlu0 %512 }
 0x101   :  { %719 = vperm.xlu0 %1001, %v640_v55   ;;  %722 = vperm.xlu1 %1002, %v641_v54   ;;  %v643_v61 = vadd.f32 %v513_v56, %v441_v58  ;;  %v458_v54 = vadd.f32 %v1260_v7, %v1287_v21  ;;  %v459_v58 = vadd.f32 %v1260_v7, %v1294_v25 }
 0x102   :  { %v509_v59 = vpop.permute.xlu1 %508 }
 0x103   :  { %v642_v8 = vadd.f32 %v509_v59, %v440_v57 }
 0x104   :  { %v521_v23 = vpop.permute.xlu0 %520 }
 0x105   :  { %725 = vperm.xlu0 %1001, %v642_v8   ;;  %728 = vperm.xlu1 %1002, %v643_v61   ;;  %v645_v17 = vadd.f32 %v521_v23, %v443_v51 }
 0x106   :  { %v517_v63 = vpop.permute.xlu1 %516 }
 0x107   :  { %v644_v26 = vadd.f32 %v517_v63, %v442_v60 }
 0x108   :  { %v529_v28 = vpop.permute.xlu0 %528 }
 0x109   :  { %731 = vperm.xlu0 %1001, %v644_v26   ;;  %v647_v61 = vadd.f32 %v529_v28, %v445_v6 }
 0x10a   :  { %v525_v30 = vpop.permute.xlu1 %524 }
 0x10b   :  { %v646_v57 = vadd.f32 %v525_v30, %v444_v22 }
 0x10c   :  { %v540_v1 = vpop.permute.xlu0 %539 }
 0x10d   :  { %v649_v31 = vadd.f32 %v540_v1, %v447_v62 }
 0x10e   :  { %v533_v33 = vpop.permute.xlu1 %532 }
 0x10f   :  { %746 = vperm.xlu1 %1002, %v649_v31   ;;  %v648_v8 = vadd.f32 %v533_v33, %v1263_v9 }
 0x110   :  { %v548_v34 = vpop.permute.xlu0 %547 }
 0x111   :  { %v651_v35 = vadd.f32 %v548_v34, %v449_v32 }
 0x112   :  { %v544_v37 = vpop.permute.xlu1 %543 }
 0x113   :  { %752 = vperm.xlu1 %1002, %v651_v35   ;;  %v650_v38 = vadd.f32 %v544_v37, %v448_v0  ;;  %v1369_v35 = vand.u32 127, %v467_v44 }
 0x114   :  { %v556_v12 = vpop.permute.xlu0 %555 }
 0x115   :  { %v653_v39 = vadd.f32 %v556_v12, %v451_v36  ;;  %749 = vperm.xlu0 %1001, %v650_v38   ;;  %v799_v37 = vadd.s32 4294967288, %v1369_v35  ;;  %v806_v12 = vadd.s32 4294967280, %v1369_v35  ;;  %v855_v6 = vadd.s32 4294967224, %v1369_v35 }
 0x116   :  { %v552_v2 = vpop.permute.xlu1 %551 }
 0x117   :  { %758 = vperm.xlu1 %1002, %v653_v39   ;;  %v652_v41 = vadd.f32 %v552_v2, %v450_v40  ;;  %v813_v39 = vadd.s32 4294967272, %v1369_v35  ;;  %v797_v2 = vsub.s32 %v1369_v35, %v1245_v47  ;;  %v809_v44 = vsub.s32 %v806_v12, %v1245_v47 }
 0x118   :  { %v564_v4 = vpop.permute.xlu0 %563  ;;  %v876_v12 = vadd.s32 4294967200, %v1369_v35 }
 0x119   :  { %v655_v11 = vadd.f32 %v564_v4, %v453_v14  ;;  %755 = vperm.xlu0 %1001, %v652_v41   ;;  %v802_v14 = vsub.s32 %v799_v37, %v1245_v47  ;;  %v820_v4 = vadd.s32 4294967264, %v1369_v35 }
 0x11a   :  { %v560_v42 = vpop.permute.xlu1 %559 }
 0x11b   :  { %764 = vperm.xlu1 %1002, %v655_v11   ;;  %v654_v43 = vadd.f32 %v560_v42, %v452_v16  ;;  %v816_v11 = vsub.s32 %v813_v39, %v1245_v47  ;;  %v827_v16 = vadd.s32 4294967256, %v1369_v35  ;;  %v834_v42 = vadd.s32 4294967248, %v1369_v35 }
 0x11c   :  { %v572_v13 = vpop.permute.xlu0 %571 }
 0x11d   :  { %v657_v45 = vadd.f32 %v572_v13, %v455_v5  ;;  %761 = vperm.xlu0 %1001, %v654_v43  }
 0x11e   :  { %v568_v48 = vpop.permute.xlu1 %567 }
 0x11f   :  { %770 = vperm.xlu1 %1002, %v657_v45   ;;  %v656_v49 = vadd.f32 %v568_v48, %v454_v18  ;;  %v841_v18 = vadd.s32 4294967240, %v1369_v35 }
 0x120   :  { %v580_v15 = vpop.permute.xlu0 %579 }
 0x121   :  { %v659_v50 = vadd.f32 %v580_v15, %v457_v46  ;;  %767 = vperm.xlu0 %1001, %v656_v49   ;;  %v823_v15 = vsub.s32 %v820_v4, %v1245_v47 }
 0x122   :  { %v576_v52 = vpop.permute.xlu1 %575 }
 0x123   :  { %776 = vperm.xlu1 %1002, %v659_v50   ;;  %v658_v53 = vadd.f32 %v576_v52, %v456_v20  ;;  %v830_v20 = vsub.s32 %v827_v16, %v1245_v47 }
 0x124   :  { %v588_v19 = vpop.permute.xlu0 %587 }
 0x125   :  { %773 = vperm.xlu0 %1001, %v658_v53   ;;  %v661_v59 = vadd.f32 %v588_v19, %v459_v58  ;;  %v837_v53 = vsub.s32 %v834_v42, %v1245_v47 }
 0x126   :  { %v584_v55 = vpop.permute.xlu1 %583 }
 0x127   :  { %734 = vperm.xlu1 %1002, %v645_v17   ;;  %v660_v56 = vadd.f32 %v584_v55, %v458_v54  ;;  %v848_v55 = vadd.s32 4294967232, %v1369_v35 }
 0x128   :  { %v596_v23 = vpop.permute.xlu0 %595 }
 0x129   :  { %779 = vperm.xlu0 %1001, %v660_v56   ;;  %v663_v60 = vadd.f32 %v596_v23, %v1300_v29  ;;  %v844_v56 = vsub.s32 %v841_v18, %v1245_v47  ;;  %v862_v23 = vadd.s32 4294967216, %v1369_v35 }
 0x12a   :  { %v592_v21 = vpop.permute.xlu1 %591 }
 0x12b   :  { %737 = vperm.xlu1 %1002, %v646_v57   ;;  %v662_v3 = vadd.f32 %v592_v21, %v1292_v24 }
 0x12d   :  { %782 = vperm.xlu0 %1001, %v661_v59  }
 0x12e   :  { %v600_v25 = vpop.permute.xlu1 %599 }
 0x12f   :  { %740 = vperm.xlu1 %1002, %v647_v61   ;;  %v664_v63 = vadd.f32 %v600_v25, %v1297_v27 }
 0x131   :  { %785 = vperm.xlu0 %1001, %v662_v3  }
 0x133   :  { %743 = vperm.xlu1 %1002, %v648_v8  }
 0x135   :  { %788 = vperm.xlu0 %1001, %v663_v60  }
 0x139   :  { %791 = vperm.xlu0 %1001, %v664_v63   ;;  %v851_v63 = vsub.s32 %v848_v55, %v1245_v47 }
 0x16c   :  { %v702_v7 = vpop.permute.xlu1 %701 }
 0x16d   :  { %v803_v13 = vrot.slane %v702_v7, %v802_v14  ;;  %v869_v7 = vadd.s32 4294967208, %v1369_v35 }
 0x16e   :  { %v699_v10 = vpop.permute.xlu0 %698 }
 0x16f   :  { %v798_v45 = vrot.slane %v699_v10, %v797_v2  ;;  %v872_v39 = vsub.s32 %v869_v7, %v1245_v47 }
 0x170   :  { %v705_v26 = vpop.permute.xlu1 %704 }
 0x171   :  { %v810_v49 = vrot.slane %v705_v26, %v809_v44  ;;  %v805_v22 = vsel %vm804_vm1, %v803_v13, %v798_v45 }
 0x173   :  { %v812_v19 = vsel %vm811_vm2, %v810_v49, %v805_v22 }
 0x174   :  { %v1352_v28 = vpop.permute.xlu1 %710  ;;  %v708_v62 = vpop.permute.xlu0 %707 }
 0x175   :  { %v817_v50 = vrot.slane %v708_v62, %v816_v11  ;;  %v824_v58 = vrot.slane %v1352_v28, %v823_v15  ;;  %v858_v62 = vsub.s32 %v855_v6, %v1245_v47 }
 0x177   :  { %v819_v61 = vsel %vm818_vm3, %v817_v50, %v812_v19 }
 0x178   :  { %v1354_v30 = vpop.permute.xlu1 %716  ;;  %v1356_v24 = vpop.permute.xlu0 %713  ;;  %v826_v28 = vsel %vm825_vm4, %v824_v58, %v819_v61 }
 0x179   :  { %v831_v21 = vrot.slane %v1356_v24, %v830_v20  ;;  %v838_v26 = vrot.slane %v1354_v30, %v837_v53 }
 0x17c   :  { %v1358_v9 = vpop.permute.xlu1 %722  ;;  %v1360_v1 = vpop.permute.xlu0 %719 }
 0x180   :  { %v1362_v29 = vpop.permute.xlu1 %728  ;;  %v1364_v31 = vpop.permute.xlu0 %725 }
 0x181   :  { %v859_v16 = vrot.slane %v1364_v31, %v858_v62 }
 0x184   :  { %v1366_v32 = vpop.permute.xlu0 %731 }
 0x185   :  { %v873_v50 = vrot.slane %v1366_v32, %v872_v39 }
 0x18a   :  { %v747_v27 = vpop.permute.xlu1 %746 }
 0x18b   :  { %v907_v46 = vrot.slane %v747_v27, %v797_v2  ;;  %v833_v27 = vsel %vm832_vm5, %v831_v21, %v826_v28 }
 0x18c   :  { %v840_v2 = vsel %vm839_vm6, %v838_v26, %v833_v27 }
 0x18e   :  { %v753_v33 = vpop.permute.xlu1 %752 }
 0x18f   :  { %v916_v17 = vrot.slane %v753_v33, %v809_v44  ;;  %v845_v33 = vrot.slane %v1360_v1, %v844_v56  ;;  %v852_v1 = vrot.slane %v1358_v9, %v851_v63  ;;  %v879_v9 = vsub.s32 %v876_v12, %v1245_v47 }
 0x190   :  { %v750_v34 = vpop.permute.xlu0 %749 }
 0x191   :  { %v911_v5 = vrot.slane %v750_v34, %v802_v14  ;;  %v890_v14 = vadd.s32 4294967184, %v1369_v35 }
 0x192   :  { %v759_v0 = vpop.permute.xlu1 %758 }
 0x193   :  { %v912_v51 = vsel %vm804_vm1, %v911_v5, %v907_v46  ;;  %v926_v60 = vrot.slane %v759_v0, %v823_v15  ;;  %v893_v18 = vsub.s32 %v890_v14, %v1245_v47 }
 0x194   :  { %v756_v36 = vpop.permute.xlu0 %755  ;;  %v917_v59 = vsel %vm811_vm2, %v916_v17, %v912_v51 }
 0x195   :  { %v921_v52 = vrot.slane %v756_v36, %v816_v11  ;;  %v865_v36 = vsub.s32 %v862_v23, %v1245_v47  ;;  %v897_v11 = vadd.s32 4294967176, %v1369_v35 }
 0x196   :  { %v1372_v38 = vpop.permute.xlu1 %764 }
 0x197   :  { %v922_v3 = vsel %vm818_vm3, %v921_v52, %v917_v59  ;;  %v936_v37 = vrot.slane %v1372_v38, %v837_v53  ;;  %v847_v38 = vsel %vm846_vm7, %v845_v33, %v840_v2  ;;  %v900_v49 = vsub.s32 %v897_v11, %v1245_v47 }
 0x198   :  { %v762_v40 = vpop.permute.xlu0 %761  ;;  %v927_v24 = vsel %vm825_vm4, %v926_v60, %v922_v3  ;;  %v854_v46 = vsel %vm853_vm8, %v852_v1, %v847_v38 }
 0x199   :  { %v931_v8 = vrot.slane %v762_v40, %v830_v20  ;;  %v883_v40 = vadd.s32 4294967192, %v1369_v35  ;;  %v866_v35 = vrot.slane %v1362_v29, %v865_v36  ;;  %v861_v15 = vsel %vm860_vm9, %v859_v16, %v854_v46 }
 0x19a   :  { %v1379_v41 = vpop.permute.xlu1 %770 }
 0x19b   :  { %v932_v34 = vsel %vm832_vm5, %v931_v8, %v927_v24  ;;  %v886_v45 = vsub.s32 %v883_v40, %v1245_v47  ;;  %v868_v47 = vsel %vm867_vm10, %v866_v35, %v861_v15 }
 0x19c   :  { %v1386_v43 = vpop.permute.xlu0 %767  ;;  %v937_v44 = vsel %vm839_vm6, %v936_v37, %v932_v34  ;;  %v875_v19 = vsel %vm874_vm11, %v873_v50, %v868_v47 }
 0x19d   :  { %v941_v0 = vrot.slane %v1386_v43, %v844_v56  ;;  %v946_v43 = vrot.slane %v1379_v41, %v851_v63 }
 0x19e   :  { %v1389_v48 = vpop.permute.xlu1 %776 }
 0x19f   :  { %v942_v5 = vsel %vm846_vm7, %v941_v0, %v937_v44  ;;  %v956_v51 = vrot.slane %v1389_v48, %v865_v36 }
 0x1a0   :  { %v1394_v54 = vpop.permute.xlu0 %773  ;;  %v947_v31 = vsel %vm853_vm8, %v946_v43, %v942_v5 }
 0x1a1   :  { %v951_v42 = vrot.slane %v1394_v54, %v858_v62 }
 0x1a2   :  { %v1398_v57 = vpop.permute.xlu1 %734 }
 0x1a3   :  { %v952_v41 = vsel %vm860_vm9, %v951_v42, %v947_v31  ;;  %v880_v52 = vrot.slane %v1398_v57, %v879_v9 }
 0x1a4   :  { %v1406_v25 = vpop.permute.xlu0 %779  ;;  %v957_v32 = vsel %vm867_vm10, %v956_v51, %v952_v41 }
 0x1a5   :  { %v961_v20 = vrot.slane %v1406_v25, %v872_v39  ;;  %v882_v6 = vsel %vm881_vm12, %v880_v52, %v875_v19 }
 0x1a6   :  { %v1410_v10 = vpop.permute.xlu1 %737 }
 0x1a7   :  { %v887_v54 = vrot.slane %v1410_v10, %v886_v45  ;;  %v962_v58 = vsel %vm874_vm11, %v961_v20, %v957_v32 }
 0x1a8   :  { %v783_v30 = vpop.permute.xlu0 %782 }
 0x1a9   :  { %v966_v53 = vrot.slane %v783_v30, %v879_v9  ;;  %v889_v61 = vsel %vm888_vm13, %v887_v54, %v882_v6 }
 0x1aa   :  { %v741_v4 = vpop.permute.xlu1 %740 }
 0x1ab   :  { %v894_v55 = vrot.slane %v741_v4, %v893_v18  ;;  %v967_v57 = vsel %vm881_vm12, %v966_v53, %v962_v58 }
 0x1ac   :  { %v786_v13 = vpop.permute.xlu0 %785 }
 0x1ad   :  { %v971_v22 = vrot.slane %v786_v13, %v886_v45  ;;  %v896_v8 = vsel %vm895_vm14, %v894_v55, %v889_v61 }
 0x1ae   :  { %v744_v17 = vpop.permute.xlu1 %743 }
 0x1af   :  { %v901_v48 = vrot.slane %v744_v17, %v900_v49  ;;  %v972_v21 = vsel %vm888_vm13, %v971_v22, %v967_v57 }
 0x1b0   :  { %v789_v29 = vpop.permute.xlu0 %788 }
 0x1b1   :  { %v976_v56 = vrot.slane %v789_v29, %v893_v18  ;;  %v903_v60 = vsel %vm902_vm15, %v901_v48, %v896_v8 }
 0x1b3   :  { %v977_v23 = vsel %vm895_vm14, %v976_v56, %v972_v21 }
 0x1b4   :  { %v792_v59 = vpop.permute.xlu0 %791 }
 0x1b5   :  { %v981_v3 = vrot.slane %v792_v59, %v900_v49 }
 0x1b7   :  { %v982_v25 = vsel %vm902_vm15, %v981_v3, %v977_v23 }
 0x1b8   :  { %v984_v63 = vsel %vm983_vm0, %v982_v25, %v903_v60 }
 0x1b9   :  { %986 = vst [vmem:[%s1459_s7] sm:$0x3] %v984_v63 }
 0x1ba   :  { %991 = vsyncpa [#allocation4], 1 }
 0x1bb   :  { %992 = vsyncpa [#allocation6], 1 }

</bundles_post_ra>
